<compile_context>
chip_gen: v7x
topology: tpu7x:2x2x1
jax: 0.10.0
libtpu: 0.0.40
codegen_flags: <defaults>
</compile_context>

<pallas_src>
import functools

import jax
import jax.numpy as jnp
from jax.experimental import pallas as pl
from jax.experimental.pallas import tpu as pltpu

_LANE = 128


def _round_up(x, m):
    return (x + m - 1) // m * m


def mlp_kernel(x_ref, w1_ref, b1_ref, w2_ref, b2_ref, w3_ref, b3_ref, o_ref, *, out_valid):
    # x tile is raw f32 [tm, in_size]; cast to bf16 in-kernel for the MXU.
    x = x_ref[...].astype(jnp.bfloat16)

    # fc1 + tanh  (bf16 MXU operands, f32 accumulation, f32 elementwise)
    h = jnp.dot(x, w1_ref[...], preferred_element_type=jnp.float32) + b1_ref[...]
    h = jnp.tanh(h)

    # fc2 + tanh
    h = jnp.dot(h.astype(jnp.bfloat16), w2_ref[...],
                preferred_element_type=jnp.float32) + b2_ref[...]
    h = jnp.tanh(h)

    # fc4 + LeakyReLU (PyTorch default negative_slope = 0.01)
    z = jnp.dot(h.astype(jnp.bfloat16), w3_ref[...],
                preferred_element_type=jnp.float32) + b3_ref[...]
    z = jnp.maximum(z, 0.01 * z)

    # mask the zero-padded output lanes so they don't participate in the softmax
    col = jax.lax.broadcasted_iota(jnp.int32, z.shape, 1)
    z = jnp.where(col < out_valid, z, -1e30)

    # softmax over the feature axis (exact normalization in f32)
    z = z - jnp.max(z, axis=-1, keepdims=True)
    e = jnp.exp(z)
    p = e / jnp.sum(e, axis=-1, keepdims=True)
    o_ref[...] = p.astype(o_ref.dtype)


def prepare_params(params):
    """Pad (lanes->128) and cast the weights/biases ONCE, outside the jitted forward."""
    w1, b1 = params["fc1"]
    w2, b2 = params["fc2"]
    w3, b3 = params["fc4"]
    in_size, hid = w1.shape
    out_size = w3.shape[1]
    hid_p = _round_up(hid, _LANE)
    out_p = _round_up(out_size, _LANE)

    def pad2(a, rows, cols):
        return jnp.pad(a, ((0, rows - a.shape[0]), (0, cols - a.shape[1])))

    w1p = pad2(w1, in_size, hid_p).astype(jnp.bfloat16)   # input dim stays unpadded
    w2p = pad2(w2, hid_p, hid_p).astype(jnp.bfloat16)
    w3p = pad2(w3, hid_p, out_p).astype(jnp.bfloat16)
    b1p = pad2(b1, 1, hid_p).astype(jnp.float32)
    b2p = pad2(b2, 1, hid_p).astype(jnp.float32)
    b3p = pad2(b3, 1, out_p).astype(jnp.float32)
    return (w1p, b1p, w2p, b2p, w3p, b3p)


def mlp_forward(x, prepped, *, out_size, block_m=512):
    """x: [batch, input_size] f32.  prepped: output of prepare_params.  Returns [batch, out_size] f32."""
    w1p, b1p, w2p, b2p, w3p, b3p = prepped
    batch, in_size = x.shape
    assert w1p.shape[0] == in_size
    hid_p = w1p.shape[1]
    out_p = w3p.shape[1]

    # Balanced batch tiles, multiples of 16 (bf16 sublane tile), >=2 grid steps
    # when possible so the "parallel" grid axis spreads across both v7x TCs.
    n_tiles = max(2, -(-batch // block_m))
    tm = _round_up(-(-batch // n_tiles), 16)
    tm = min(tm, block_m)
    batch_p = _round_up(batch, tm)
    grid = (batch_p // tm,)

    # Pad only the batch axis of x; keep raw f32 (cast to bf16 happens in-kernel).
    xp = jnp.pad(x, ((0, batch_p - batch), (0, 0)))

    kernel = functools.partial(mlp_kernel, out_valid=out_size)

    out_padded = pl.pallas_call(
        kernel,
        out_shape=jax.ShapeDtypeStruct((batch_p, out_p), jnp.bfloat16),
        grid_spec=pltpu.PrefetchScalarGridSpec(
            num_scalar_prefetch=0,
            grid=grid,
            in_specs=[
                pl.BlockSpec((tm, in_size), lambda i: (i, 0)),     # x tile (pipelined, f32)
                pl.BlockSpec((in_size, hid_p), lambda i: (0, 0)),  # W1 (resident)
                pl.BlockSpec((1, hid_p), lambda i: (0, 0)),        # b1
                pl.BlockSpec((hid_p, hid_p), lambda i: (0, 0)),    # W2
                pl.BlockSpec((1, hid_p), lambda i: (0, 0)),        # b2
                pl.BlockSpec((hid_p, out_p), lambda i: (0, 0)),    # W3
                pl.BlockSpec((1, out_p), lambda i: (0, 0)),        # b3
            ],
            out_specs=pl.BlockSpec((tm, out_p), lambda i: (i, 0)),
        ),
        compiler_params=pltpu.CompilerParams(
            dimension_semantics=("parallel",),
            vmem_limit_bytes=32 * 1024 * 1024,
        ),
    )(xp, w1p, b1p, w2p, b2p, w3p, b3p)

    return out_padded[:batch, :out_size].astype(jnp.float32)


def mlp_reference(x, params):
    """Pure-JAX f32 reference (mirrors the PyTorch module)."""
    w1, b1 = params["fc1"]
    w2, b2 = params["fc2"]
    w3, b3 = params["fc4"]
    h = jnp.tanh(x @ w1 + b1)
    h = jnp.tanh(h @ w2 + b2)
    z = h @ w3 + b3
    z = jnp.where(z >= 0, z, 0.01 * z)
    return jax.nn.softmax(z, axis=-1)


def init_params(key, input_size, hidden_size, output_size=5):
    """Deterministic init mimicking nn.Linear (weights stored transposed [in, out])."""
    ks = jax.random.split(key, 6)

    def linear(kw, kb, fan_in, fan_out):
        bound = 1.0 / jnp.sqrt(fan_in)
        w = jax.random.uniform(kw, (fan_in, fan_out), jnp.float32, -bound, bound)
        b = jax.random.uniform(kb, (1, fan_out), jnp.float32, -bound, bound)
        return w, b

    return {
        "fc1": linear(ks[0], ks[1], input_size, hidden_size),
        "fc2": linear(ks[2], ks[3], hidden_size, hidden_size),
        "fc4": linear(ks[4], ks[5], hidden_size, output_size),
    }


if __name__ == "__main__":
    batch, input_size, hidden_size, output_size = 64, 32, 32, 5

    key = jax.random.PRNGKey(0)
    k_x, k_p = jax.random.split(key)
    x = jax.random.normal(k_x, (batch, input_size), dtype=jnp.float32)
    params = init_params(k_p, input_size, hidden_size, output_size)

    prepped = prepare_params(params)                      # pad/cast weights once
    fwd = jax.jit(functools.partial(mlp_forward, out_size=output_size))
    out = jax.block_until_ready(fwd(x, prepped))

    # sanity: shape, softmax rows sum to 1, and agreement with the f32 reference
    assert out.shape == (batch, output_size)
    row_sums = jnp.sum(out, axis=-1)
    assert jnp.allclose(row_sums, jnp.ones_like(row_sums), atol=1e-2), \
        float(jnp.max(jnp.abs(row_sums - 1.0)))
    ref = mlp_reference(x, params)
    assert jnp.allclose(out, ref, atol=5e-2), float(jnp.max(jnp.abs(out - ref)))

    print("KERNEL_OK")
</pallas_src>

<mosaic_0001>
module attributes {stable_mosaic.version = 11 : i64} {
  func.func @mlp_kernel(%arg0: i32, %arg1: memref<32x32xf32, #tpu.memory_space<vmem>>, %arg2: memref<32x128xbf16, #tpu.memory_space<vmem>>, %arg3: memref<1x128xf32, #tpu.memory_space<vmem>>, %arg4: memref<128x128xbf16, #tpu.memory_space<vmem>>, %arg5: memref<1x128xf32, #tpu.memory_space<vmem>>, %arg6: memref<128x128xbf16, #tpu.memory_space<vmem>>, %arg7: memref<1x128xf32, #tpu.memory_space<vmem>>, %arg8: memref<32x128xbf16, #tpu.memory_space<vmem>>) attributes {dimension_semantics = [#tpu.dimension_semantics<parallel>], iteration_bounds = array<i64: 2>, scalar_prefetch = 0 : i64, scratch_operands = 0 : i64, tpu.core_type = #tpu.core_type<tc>, window_params = [{transform_indices = @transform_0, window_bounds = array<i64: 32, 32>}, {pipeline_mode = #tpu.pipeline_mode<synchronous>, transform_indices = @transform_1, window_bounds = array<i64: 32, 128>}, {pipeline_mode = #tpu.pipeline_mode<synchronous>, transform_indices = @transform_2, window_bounds = array<i64: 1, 128>}, {pipeline_mode = #tpu.pipeline_mode<synchronous>, transform_indices = @transform_3, window_bounds = array<i64: 128, 128>}, {pipeline_mode = #tpu.pipeline_mode<synchronous>, transform_indices = @transform_4, window_bounds = array<i64: 1, 128>}, {pipeline_mode = #tpu.pipeline_mode<synchronous>, transform_indices = @transform_5, window_bounds = array<i64: 128, 128>}, {pipeline_mode = #tpu.pipeline_mode<synchronous>, transform_indices = @transform_6, window_bounds = array<i64: 1, 128>}, {transform_indices = @transform_7, window_bounds = array<i64: 32, 128>}]} {
    %c0 = arith.constant 0 : index
    %c0_0 = arith.constant 0 : index
    %0 = vector.load %arg1[%c0, %c0_0] : memref<32x32xf32, #tpu.memory_space<vmem>>, vector<32x32xf32>
    %1 = arith.truncf %0 : vector<32x32xf32> to vector<32x32xbf16>
    %c0_1 = arith.constant 0 : index
    %c0_2 = arith.constant 0 : index
    %2 = vector.load %arg2[%c0_1, %c0_2] : memref<32x128xbf16, #tpu.memory_space<vmem>>, vector<32x128xbf16>
    %cst = arith.constant dense<0.000000e+00> : vector<32x128xf32>
    %3 = tpu.matmul %1, %2, %cst {dimension_numbers = #tpu.dot_dimension_numbers<[1], [0], [0], [1], [0, 0, 1, 1], [], []>} : vector<32x32xbf16>, vector<32x128xbf16>, vector<32x128xf32> -> vector<32x128xf32>
    %c0_3 = arith.constant 0 : index
    %c0_4 = arith.constant 0 : index
    %4 = vector.load %arg3[%c0_3, %c0_4] : memref<1x128xf32, #tpu.memory_space<vmem>>, vector<1x128xf32>
    %5 = vector.broadcast %4 : vector<1x128xf32> to vector<32x128xf32>
    %6 = arith.addf %3, %5 : vector<32x128xf32>
    %7 = math.tanh %6 : vector<32x128xf32>
    %8 = arith.truncf %7 : vector<32x128xf32> to vector<32x128xbf16>
    %c0_5 = arith.constant 0 : index
    %c0_6 = arith.constant 0 : index
    %9 = vector.load %arg4[%c0_5, %c0_6] : memref<128x128xbf16, #tpu.memory_space<vmem>>, vector<128x128xbf16>
    %cst_7 = arith.constant dense<0.000000e+00> : vector<32x128xf32>
    %10 = tpu.matmul %8, %9, %cst_7 {dimension_numbers = #tpu.dot_dimension_numbers<[1], [0], [0], [1], [0, 0, 1, 1], [], []>} : vector<32x128xbf16>, vector<128x128xbf16>, vector<32x128xf32> -> vector<32x128xf32>
    %c0_8 = arith.constant 0 : index
    %c0_9 = arith.constant 0 : index
    %11 = vector.load %arg5[%c0_8, %c0_9] : memref<1x128xf32, #tpu.memory_space<vmem>>, vector<1x128xf32>
    %12 = vector.broadcast %11 : vector<1x128xf32> to vector<32x128xf32>
    %13 = arith.addf %10, %12 : vector<32x128xf32>
    %14 = math.tanh %13 : vector<32x128xf32>
    %15 = arith.truncf %14 : vector<32x128xf32> to vector<32x128xbf16>
    %c0_10 = arith.constant 0 : index
    %c0_11 = arith.constant 0 : index
    %16 = vector.load %arg6[%c0_10, %c0_11] : memref<128x128xbf16, #tpu.memory_space<vmem>>, vector<128x128xbf16>
    %cst_12 = arith.constant dense<0.000000e+00> : vector<32x128xf32>
    %17 = tpu.matmul %15, %16, %cst_12 {dimension_numbers = #tpu.dot_dimension_numbers<[1], [0], [0], [1], [0, 0, 1, 1], [], []>} : vector<32x128xbf16>, vector<128x128xbf16>, vector<32x128xf32> -> vector<32x128xf32>
    %c0_13 = arith.constant 0 : index
    %c0_14 = arith.constant 0 : index
    %18 = vector.load %arg7[%c0_13, %c0_14] : memref<1x128xf32, #tpu.memory_space<vmem>>, vector<1x128xf32>
    %19 = vector.broadcast %18 : vector<1x128xf32> to vector<32x128xf32>
    %20 = arith.addf %17, %19 : vector<32x128xf32>
    %cst_15 = arith.constant 0.00999999977 : f32
    %21 = vector.broadcast %cst_15 : f32 to vector<32x128xf32>
    %22 = arith.mulf %21, %20 : vector<32x128xf32>
    %23 = arith.maximumf %20, %22 : vector<32x128xf32>
    %24 = tpu.iota {dimensions = array<i32: 1>} : vector<32x128xi32>
    %c5_i32 = arith.constant 5 : i32
    %25 = vector.broadcast %c5_i32 : i32 to vector<32x128xi32>
    %26 = arith.cmpi slt, %24, %25 : vector<32x128xi32>
    %cst_16 = arith.constant -1.000000e+30 : f32
    %27 = vector.broadcast %cst_16 : f32 to vector<32x128xf32>
    %28 = arith.select %26, %23, %27 : vector<32x128xi1>, vector<32x128xf32>
    %cst_17 = arith.constant dense<0xFF800000> : vector<32xf32>
    %29 = vector.multi_reduction <maximumf>, %28, %cst_17 [1] : vector<32x128xf32> to vector<32xf32>
    %30 = vector.shape_cast %29 : vector<32xf32> to vector<32x1xf32>
    %31 = vector.broadcast %30 : vector<32x1xf32> to vector<32x128xf32>
    %32 = arith.subf %28, %31 : vector<32x128xf32>
    %33 = math.exp %32 : vector<32x128xf32>
    %cst_18 = arith.constant dense<0.000000e+00> : vector<32xf32>
    %34 = vector.multi_reduction <add>, %33, %cst_18 [1] : vector<32x128xf32> to vector<32xf32>
    %35 = vector.shape_cast %34 : vector<32xf32> to vector<32x1xf32>
    %36 = vector.broadcast %35 : vector<32x1xf32> to vector<32x128xf32>
    %37 = arith.divf %33, %36 : vector<32x128xf32>
    %38 = arith.truncf %37 : vector<32x128xf32> to vector<32x128xbf16>
    %c0_19 = arith.constant 0 : index
    %c0_20 = arith.constant 0 : index
    %39 = vector.load %arg8[%c0_19, %c0_20] : memref<32x128xbf16, #tpu.memory_space<vmem>>, vector<32x128xbf16>
    tpu.vector_store %arg8[%c0_19, %c0_20], %38 {strides = array<i32>} : memref<32x128xbf16, #tpu.memory_space<vmem>>, vector<32x128xbf16>,
    return
  }
  func.func @transform_0(%arg0: i32) -> (i32, i32) {
    %c0_i32 = arith.constant 0 : i32
    %c0_i32_0 = arith.constant 0 : i32
    return %arg0, %c0_i32 : i32, i32
  }
  func.func @transform_1(%arg0: i32) -> (i32, i32) {
    %c0_i32 = arith.constant 0 : i32
    %c0_i32_0 = arith.constant 0 : i32
    %c0_i32_1 = arith.constant 0 : i32
    return %c0_i32, %c0_i32_0 : i32, i32
  }
  func.func @transform_2(%arg0: i32) -> (i32, i32) {
    %c0_i32 = arith.constant 0 : i32
    %c0_i32_0 = arith.constant 0 : i32
    %c0_i32_1 = arith.constant 0 : i32
    return %c0_i32, %c0_i32_0 : i32, i32
  }
  func.func @transform_3(%arg0: i32) -> (i32, i32) {
    %c0_i32 = arith.constant 0 : i32
    %c0_i32_0 = arith.constant 0 : i32
    %c0_i32_1 = arith.constant 0 : i32
    return %c0_i32, %c0_i32_0 : i32, i32
  }
  func.func @transform_4(%arg0: i32) -> (i32, i32) {
    %c0_i32 = arith.constant 0 : i32
    %c0_i32_0 = arith.constant 0 : i32
    %c0_i32_1 = arith.constant 0 : i32
    return %c0_i32, %c0_i32_0 : i32, i32
  }
  func.func @transform_5(%arg0: i32) -> (i32, i32) {
    %c0_i32 = arith.constant 0 : i32
    %c0_i32_0 = arith.constant 0 : i32
    %c0_i32_1 = arith.constant 0 : i32
    return %c0_i32, %c0_i32_0 : i32, i32
  }
  func.func @transform_6(%arg0: i32) -> (i32, i32) {
    %c0_i32 = arith.constant 0 : i32
    %c0_i32_0 = arith.constant 0 : i32
    %c0_i32_1 = arith.constant 0 : i32
    return %c0_i32, %c0_i32_0 : i32, i32
  }
  func.func @transform_7(%arg0: i32) -> (i32, i32) {
    %c0_i32 = arith.constant 0 : i32
    %c0_i32_0 = arith.constant 0 : i32
    return %arg0, %c0_i32 : i32, i32
  }
}

</mosaic_0001>

<bundles_post_ra>
// kernel: mlp_forward.1
= control target key start
LH: loop header
LB: loop body
LE: loop exit
PB: predicated region body
PF: predicated region fallthrough
CT: control target
= control target key end

     0   :  { %12 = vsyncpa [#allocation3], 0  ;;  %s1055_s24 = smov 0   ;;  %s1157_s0 = inlined_call_operand.vmem [shape: f32[64,32], index: 0, kind: input, shape index: {}]   ;;  %s1158_s1 = inlined_call_operand.vmem [shape: bf16[32,128], index: 1, kind: input, shape index: {}]   ;;  %s1159_s2 = inlined_call_operand.vmem [shape: f32[1,128], index: 2, kind: input, shape index: {}]   ;;  %s1160_s3 = inlined_call_operand.vmem [shape: bf16[128,128], index: 3, kind: input, shape index: {}]   ;;  %s1161_s4 = inlined_call_operand.vmem [shape: f32[1,128], index: 4, kind: input, shape index: {}]   ;;  %s1162_s5 = inlined_call_operand.hbm [shape: bf16[128,128], index: 5, kind: input, shape index: {}]   ;;  %s1163_s6 = inlined_call_operand.vmem [shape: f32[1,128], index: 6, kind: input, shape index: {}]   ;;  %s1164_s7 = inlined_call_operand.vmem [shape: bf16[64,128], index: 7, kind: output, shape index: {}]  }
   0x1 LB: > { %s774_s25 = sadd.s32 4294967295, %s1010_s24   ;;  %p776_p0 = scmp.ge.s32.totalorder %s1010_s24, 1  ;;  %s1010_s24 = sphi %s1055_s24, %s18_s24  }
   0x2   : > { %p201_p1 = scmp.lt.s32.totalorder %s1010_s24, 3  ;;  %s1012_s26 = smov [#allocation2]  }
   0x3   : > { %s225_s27 = sshll.u32 %s1012_s26, 4  ;;  %p1069_p3 = scmp.eq.s32.totalorder %s774_s25, 0  ;;  %s226_s27 = int_to_ptr.vmem [resolvable:$true] %s225_s27 }
   0x4   : > { %p1063_p2 = pnand %p776_p0, %p201_p1  ;;  %s972_s10 = scalar_lea.hbm %s1162_s5, 1024 }
   0x5   : > { %s1169_s29 = scalar_select %p1069_p3, 1, 0 }
   0x6   : > { %s1168_s28 = scalar_select %p1063_p2, 1, 0 }
   0x7   : > { %p905_p4 = pneg %p1063_p2  ;;  %p973_p6 = scmp.ne.s32.totalorder %s1162_s5, %s972_s10 }
   0x8   : > { %p979_p10 = scmp.lt.u32.totalorder %s972_s10, %s1162_s5 }
   0x9   : > { %p1077_p5 = pnand %p1069_p3, %p905_p4 }
   0xb   : > { %p974_p7 = pneg %p1077_p5 }
   0xd   : > { %p975_p8 = pnand %p974_p7, %p973_p6 }
   0xf   : > { %p976_p9 = pneg %p975_p8 }
  0x11   : > { %p981_p11 = pnand %p979_p10, %p976_p9 }
  0x13   : > { %984 = shalt.err (!%p981_p11)
}
  0x14   : > { %s985_s15 = scalar_lea.vmem %s226_s27, 1024  ;;  %p993_p1 = scmp.lt.s32.totalorder %s226_s27, %s226_s27 }
  0x15   : > { %p986_p12 = scmp.ne.s32.totalorder %s226_s27, %s985_s15  ;;  %p994_p4 = scmp.lt.s32.totalorder %s985_s15, %s985_s15 }
  0x17   : > { %p988_p13 = pnand %p986_p12, %p974_p7  ;;  %p995_p3 = por %p994_p4, %p993_p1 }
  0x19   : > { %p989_p0 = pneg %p988_p13 }
  0x1b   : > { %p996_p2 = pnand %p995_p3, %p989_p0 }
  0x1d   : > { %999 = shalt.err (!%p996_p2)
}
  0x1e   : > { %s1013_s16 = smov 64   ;;  %s1014_s17 = smov 4  }
  0x1f   : > { %908 = dma.hbm_to_vmem [thread:$0]  (!%p1077_p5), %s1162_s5, 1024, %s226_s27, [#allocation3], %s1013_s16, %s1013_s16, %s1014_s17  }
  0x20   : > { %p1171_p6 = scmp.ne.s32.totalorder %s1168_s28, 0 }
  0x21   : > { %p1172_p8 = scmp.ne.s32.totalorder (!%p1171_p6), %s1169_s29, 0 }
  0x22   : > { %253 = sbr.rel (%p1171_p6) target bundleno = 1057 (0x421), region = 48 }
  0x29   : > { %1005 = dma.done.wait (%p1172_p8), [#allocation3], 1024  }
  0x2a   : > { %1007 = vsyncadd (%p1172_p8), [#allocation3], 4294966272  ;;  %s781_s20 = sshll.u32 %s774_s25, 2  ;;  %v922_v0 = vld [vmem:[%s1158_s1] sm:$0xff]   ;;  %v923_v1 = vld [vmem:[%s1158_s1 + $0x8] sm:$0xff]   ;;  %vm327_vm0 = vcmask 261120   ;;  %v643_v54 = vlaneseq }
  0x2b   : > { %p286_p2 = scmp.lt.s32.totalorder %s781_s20, 7  ;;  %853 = vmatprep.subr.bf16.mxu0 %v922_v0  ;;  %v924_v7 = vld [vmem:[%s1160_s3] sm:$0xff]   ;;  %v925_v8 = vld [vmem:[%s1160_s3 + $0x8] sm:$0xff]   ;;  %v926_v10 = vld [vmem:[%s1160_s3 + $0x10] sm:$0xff]  }
  0x2c   : > { %854 = vmatpush3.bf16.msra.mxu0 %v922_v0  ;;  %861 = vmatprep.subr.bf16.mxu1 %v924_v7  ;;  %v927_v11 = vld [vmem:[%s1160_s3 + $0x18] sm:$0xff]   ;;  %v928_v12 = vld [vmem:[%s1160_s3 + $0x20] sm:$0xff]   ;;  %v929_v13 = vld [vmem:[%s1160_s3 + $0x28] sm:$0xff]   ;;  %v644_v57 = vand.u32 127, %v643_v54 }
  0x2d   : > { %s1174_s20 = smov (!%p286_p2, %s781_s20), 7  ;;  %855 = vmatprep.subr.bf16.mxu0 %v923_v1  ;;  %862 = vmatpush3.bf16.msra.mxu1 %v924_v7  ;;  %v930_v14 = vld [vmem:[%s1160_s3 + $0x30] sm:$0xff]   ;;  %v931_v15 = vld [vmem:[%s1160_s3 + $0x38] sm:$0xff]   ;;  %v932_v16 = vld [vmem:[#allocation2] sm:$0xff]  }
  0x2e   : > { %s782_s21 = sshll.u32 %s1174_s20, 3  ;;  %863 = vmatprep.subr.bf16.mxu1 %v925_v8  ;;  %v933_v17 = vld [vmem:[#allocation2 + $0x8] sm:$0xff]   ;;  %v934_v18 = vld [vmem:[#allocation2 + $0x10] sm:$0xff]   ;;  %v785_v19 = vld [vmem:[%s1159_s2] ss:$0 sm:$0xff]  ;;  %vm645_vm1 = vcmp.lt.s32.totalorder %v644_v57, 5 }
  0x2f   : > { %s289_s26 = scalar_lea.vmem %s1157_s0, %s782_s21  ;;  %v935_v34 = vld [vmem:[#allocation2 + $0x18] sm:$0xff]   ;;  %v936_v35 = vld [vmem:[#allocation2 + $0x20] sm:$0xff]   ;;  %v937_v36 = vld [vmem:[#allocation2 + $0x28] sm:$0xff]   ;;  %s784_s29 = sshll.u32 %s1174_s20, 2 }
  0x30   : > { %v298_v2 = vld [vmem:[%s289_s26] sm:$0xff]  ;;  %v299_v3 = vld [vmem:[%s289_s26 + $0x8] sm:$0xff]  ;;  %v300_v4 = vld [vmem:[%s289_s26 + $0x10] sm:$0xff]  ;;  %856 = vmatpush3.bf16.msra.mxu0 %v923_v1  ;;  %s295_s11 = scalar_lea.vmem %s1164_s7, %s784_s29 }
  0x31   : > { %v302_v5 = vpack.c.bf16 %v299_v3, %v298_v2  ;;  %v301_v6 = vld [vmem:[%s289_s26 + $0x18] sm:$0xff]  ;;  %864 = vmatpush3.bf16.msra.mxu1 %v925_v8  ;;  %881 = vmatprep.subr.bf16.mxu0 %v932_v16  ;;  %v938_v37 = vld [vmem:[#allocation2 + $0x30] sm:$0xff]   ;;  %v790_v39 = vld [vmem:[%s1161_s4] ss:$0 sm:$0xff] }
  0x32   : > { %v303_v9 = vpack.c.bf16 %v301_v6, %v300_v4  ;;  %865 = vmatprep.subr.bf16.mxu1 %v926_v10  ;;  %v939_v38 = vld [vmem:[#allocation2 + $0x38] sm:$0xff]   ;;  %v799_v55 = vld [vmem:[%s1163_s6] ss:$0 sm:$0xff] }
  0x33   : > { %857 = vmatprep.mubr.msk.bf16.mxu0 %vm327_vm0, %v302_v5 }
  0x34   : > { %858 = vmatmul.mubr.msk.bf16.vlgmr.msra.gmra.mrb[0].mxu0 %vm327_vm0, %v303_v9 }
  0x35   : > { %866 = vmatpush3.bf16.msra.mxu1 %v926_v10  ;;  %882 = vmatpush3.bf16.msra.mxu0 %v932_v16 }
  0x36   : > { %867 = vmatprep.subr.bf16.mxu1 %v927_v11  ;;  %883 = vmatprep.subr.bf16.mxu0 %v933_v17 }
  0x39   : > { %868 = vmatpush3.bf16.msra.mxu1 %v927_v11  ;;  %884 = vmatpush3.bf16.msra.mxu0 %v933_v17 }
  0x3a   : > { %869 = vmatprep.subr.bf16.mxu1 %v928_v12  ;;  %885 = vmatprep.subr.bf16.mxu0 %v934_v18 }
  0x3d   : > { %870 = vmatpush3.bf16.msra.mxu1 %v928_v12  ;;  %886 = vmatpush3.bf16.msra.mxu0 %v934_v18 }
  0x3e   : > { %871 = vmatprep.subr.bf16.mxu1 %v929_v13  ;;  %887 = vmatprep.subr.bf16.mxu0 %v935_v34 }
  0x41   : > { %872 = vmatpush3.bf16.msra.mxu1 %v929_v13  ;;  %888 = vmatpush3.bf16.msra.mxu0 %v935_v34 }
  0x42   : > { %873 = vmatprep.subr.bf16.mxu1 %v930_v14  ;;  %889 = vmatprep.subr.bf16.mxu0 %v936_v35 }
  0x45   : > { %874 = vmatpush3.bf16.msra.mxu1 %v930_v14  ;;  %890 = vmatpush3.bf16.msra.mxu0 %v936_v35 }
  0x46   : > { %875 = vmatprep.subr.bf16.mxu1 %v931_v15  ;;  %891 = vmatprep.subr.bf16.mxu0 %v937_v36 }
  0x49   : > { %876 = vmatpush3.bf16.msra.mxu1 %v931_v15  ;;  %892 = vmatpush3.bf16.msra.mxu0 %v937_v36 }
  0x4a   : > { %893 = vmatprep.subr.bf16.mxu0 %v938_v37 }
  0x4d   : > { %894 = vmatpush3.bf16.msra.mxu0 %v938_v37 }
  0x4e   : > { %895 = vmatprep.subr.bf16.mxu0 %v939_v38 }
  0x51   : > { %896 = vmatpush3.bf16.msra.mxu0 %v939_v38 }
 0x107   : > { %v859_v20 = vpop.f32.mrb[0].mxu0 }
 0x108   : > { %v377_v21 = vadd.f32 %v859_v20, %v785_v19  ;;  %v368_v22 = vpop.f32.mrb[1].mxu0 }
 0x109   : > { %v369_v23 = vadd.f32 %v785_v19, %v368_v22  ;;  %v860_v24 = vpop.f32.mrb[2].mxu0 }
 0x10a   : > { %940 = vtanh.f32 %v377_v21  ;;  %v380_v25 = vadd.f32 %v860_v24, %v785_v19  ;;  %v371_v26 = vpop.f32.mrb[3].mxu0 }
 0x10b   : > { %942 = vtanh.f32 %v369_v23  ;;  %v372_v27 = vadd.f32 %v785_v19, %v371_v26 }
 0x10c   : > { %944 = vtanh.f32 %v380_v25 }
 0x10d   : > { %946 = vtanh.f32 %v372_v27 }
 0x114   : > { %v941_v28 = vpop.eup %940 }
 0x115   : > { %v943_v29 = vpop.eup %942 }
 0x116   : > { %v945_v30 = vpop.eup %944 }
 0x117   : > { %v947_v31 = vpop.eup %946  ;;  %v388_v32 = vpack.c.bf16 %v945_v30, %v941_v28 }
 0x118   : > { %v387_v33 = vpack.c.bf16 %v947_v31, %v943_v29 }
 0x11a   : > { %877 = vmatprep.mubr.bf16.mxu1 %v387_v33 }
 0x11b   : > { %878 = vmatmul.mubr.bf16.vlgmr.msra.gmra.mrb[0].mxu1 %v388_v32 }
 0x1ee   : > { %v879_v40 = vpop.f32.mrb[0].mxu1 }
 0x1ef   : > { %v503_v41 = vadd.f32 %v879_v40, %v790_v39  ;;  %v494_v42 = vpop.f32.mrb[1].mxu1 }
 0x1f0   : > { %v495_v43 = vadd.f32 %v790_v39, %v494_v42  ;;  %v880_v44 = vpop.f32.mrb[2].mxu1 }
 0x1f1   : > { %948 = vtanh.f32 %v503_v41  ;;  %v506_v45 = vadd.f32 %v880_v44, %v790_v39  ;;  %v497_v46 = vpop.f32.mrb[3].mxu1 }
 0x1f2   : > { %950 = vtanh.f32 %v495_v43  ;;  %v498_v47 = vadd.f32 %v790_v39, %v497_v46 }
 0x1f3   : > { %952 = vtanh.f32 %v506_v45 }
 0x1f4   : > { %954 = vtanh.f32 %v498_v47 }
 0x1fb   : > { %v949_v48 = vpop.eup %948 }
 0x1fc   : > { %v951_v49 = vpop.eup %950 }
 0x1fd   : > { %v953_v50 = vpop.eup %952 }
 0x1fe   : > { %v955_v51 = vpop.eup %954  ;;  %v514_v52 = vpack.c.bf16 %v953_v50, %v949_v48 }
 0x1ff   : > { %v513_v53 = vpack.c.bf16 %v955_v51, %v951_v49 }
 0x201   : > { %897 = vmatprep.mubr.bf16.mxu0 %v513_v53 }
 0x202   : > { %898 = vmatmul.mubr.bf16.vlgmr.msra.gmra.mrb[4].mxu0 %v514_v52 }
 0x2d5   : > { %v899_v56 = vpop.f32.mrb[4].mxu0 }
 0x2d6   : > { %v629_v58 = vadd.f32 %v899_v56, %v799_v55  ;;  %v620_v59 = vpop.f32.mrb[5].mxu0 }
 0x2d7   : > { %v621_v60 = vadd.f32 %v799_v55, %v620_v59  ;;  %v900_v61 = vpop.f32.mrb[6].mxu0 }
 0x2d8   : > { %v637_v62 = vmul.f32 0.01, %v629_v58  ;;  %v632_v63 = vadd.f32 %v900_v61, %v799_v55  ;;  %v623_v0 = vpop.f32.mrb[7].mxu0 }
 0x2d9   : > { %v635_v1 = vmul.f32 0.01, %v621_v60  ;;  %v624_v2 = vadd.f32 %v799_v55, %v623_v0 }
 0x2da   : > { %v638_v3 = vmul.f32 0.01, %v632_v63  ;;  %v641_v4 = vmax.f32 %v629_v58, %v637_v62 }
 0x2db   : > { %v636_v5 = vmul.f32 0.01, %v624_v2  ;;  %v639_v6 = vmax.f32 %v621_v60, %v635_v1 }
 0x2dc   : > { %v648_v7 = vsel %vm645_vm1, %v641_v4, -1e+30  ;;  %v642_v8 = vmax.f32 %v632_v63, %v638_v3 }
 0x2dd   : > { %654 = vmax.xlane.f32.xlu1 %v648_v7  ;;  %v646_v9 = vsel %vm645_vm1, %v639_v6, -1e+30  ;;  %v640_v10 = vmax.f32 %v624_v2, %v636_v5 }
 0x2de   : > { %650 = vmax.xlane.f32.xlu0 %v646_v9  ;;  %v649_v11 = vsel %vm645_vm1, %v642_v8, -1e+30 }
 0x2df   : > { %v647_v12 = vsel %vm645_vm1, %v640_v10, -1e+30 }
 0x2e1   : > { %656 = vmax.xlane.f32.xlu1 %v649_v11 }
 0x2e2   : > { %652 = vmax.xlane.f32.xlu0 %v647_v12 }
 0x36a   : > { %v655_v13 = vpop.xlane.xlu1 %654 }
 0x36b   : > { %v660_v14 = vsub.f32 %v648_v7, %v655_v13  ;;  %v651_v15 = vpop.xlane.xlu0 %650 }
 0x36c   : > { %v658_v16 = vsub.f32 %v646_v9, %v651_v15 }
 0x36d   : > { %v666_v19 = vmul.f32 1.442695, %v660_v14 }
 0x36e   : > { %v662_v17 = vmul.f32 1.442695, %v658_v16  ;;  %v657_v18 = vpop.xlane.xlu1 %656 }
 0x36f   : > { %v653_v20 = vpop.xlane.xlu0 %652  ;;  %v661_v21 = vsub.f32 %v649_v11, %v657_v18 }
 0x370   : > { %956 = vpow2.f32 %v662_v17  ;;  %v659_v22 = vsub.f32 %v647_v12, %v653_v20 }
 0x371   : > { %958 = vpow2.f32 %v666_v19  ;;  %v668_v24 = vmul.f32 1.442695, %v661_v21 }
 0x372   : > { %v664_v23 = vmul.f32 1.442695, %v659_v22 }
 0x374   : > { %960 = vpow2.f32 %v664_v23 }
 0x375   : > { %962 = vpow2.f32 %v668_v24 }
 0x37a   : > { %v957_v25 = vpop.eup %956 }
 0x37b   : > { %670 = vadd.xlane.f32.xlu0 %v957_v25  ;;  %v959_v26 = vpop.eup %958 }
 0x37e   : > { %v961_v27 = vpop.eup %960 }
 0x37f   : > { %674 = vadd.xlane.f32.xlu0 %v959_v26  ;;  %672 = vadd.xlane.f32.xlu1 %v961_v27  ;;  %v963_v28 = vpop.eup %962 }
 0x383   : > { %676 = vadd.xlane.f32.xlu1 %v963_v28 }
 0x408   : > { %v671_v29 = vpop.xlane.xlu0 %670 }
 0x409   : > { %964 = vrcp.f32 %v671_v29 }
 0x40c   : > { %v673_v30 = vpop.xlane.xlu1 %672  ;;  %v675_v31 = vpop.xlane.xlu0 %674 }
 0x40d   : > { %966 = vrcp.f32 %v673_v30 }
 0x40e   : > { %968 = vrcp.f32 %v675_v31 }
 0x410   : > { %v677_v32 = vpop.xlane.xlu1 %676 }
 0x411   : > { %970 = vrcp.f32 %v677_v32 }
 0x413   : > { %v965_v33 = vpop.eup %964 }
 0x414   : > { %v679_v35 = vmul.f32 %v965_v33, %v957_v25 }
 0x417   : > { %v967_v34 = vpop.eup %966 }
 0x418   : > { %v681_v36 = vmul.f32 %v967_v34, %v961_v27  ;;  %v969_v37 = vpop.eup %968 }
 0x419   : > { %v683_v40 = vmul.f32 %v969_v37, %v959_v26 }
 0x41a   : > { %v821_v38 = vpack.c.bf16 %v681_v36, %v679_v35 }
 0x41b   : > { %v971_v39 = vpop.eup %970 }
 0x41c   : > { %822 = vst [vmem:[%s295_s11] sm:$0xff] %v821_v38   ;;  %v685_v41 = vmul.f32 %v971_v39, %v963_v28 }
 0x41e   : > { %v826_v42 = vpack.c.bf16 %v685_v41, %v683_v40 }
 0x420   : > { %828 = vst [vmem:[%s295_s11 + $0x8] sm:$0xff] %v826_v42  }
 0x421 PF: > { %s18_s24 = sadd.s32 1, %s1010_s24  }
 0x422   : > { %p15_p3 = scmp.ge.s32.totalorder %s18_s24, 4  }
 0x424   :  { %17 = sbr.rel (!%p15_p3) target bundleno = 1 (0x1), region = 83 }
 0x42b   :  { %728 = vsyncpa [#allocation3], 1 }
 0x42c   :  { %730 = vsyncpa [#allocation3 + $0x1], 1 }

</bundles_post_ra>
